<compile_context>
chip_gen: v6e
topology: v6e:2x2x1
jax: 0.10.0
libtpu: 0.0.40
codegen_flags: <defaults>
</compile_context>

<pallas_src>
import jax
import jax.numpy as jnp
import numpy as np
from jax import lax
from jax.experimental import pallas as pl
from jax.experimental.pallas import tpu as pltpu

# ---- small, test-friendly hyperparameters (stand-ins for the real constants)
THOUGHT_SIZE = 64     # Encoder.thought_size (1200 in the original)
WORD_SIZE = 32        # Encoder.word_size   (620  in the original)
VOCAB_SIZE = 128      # VOCAB_SIZE
MAXLEN = 8            # MAXLEN
BATCH = 6             # number of sentences (forward uses batch-2 internally)

TH2 = 2 * THOUGHT_SIZE          # thought part of the LSTM input
IN_SIZE = TH2 + WORD_SIZE       # full LSTM input size
HID = WORD_SIZE                 # LSTM hidden size


def _skip_decoder_kernel(tc_ref, dw_ref, wih_th_ref, wih_w_ref, whh_ref,
                         b_ref, wout_ref, bout_ref, pred_ref, hall_ref):
    """Whole SkipDecoder forward (teacher forcing) in one invocation.

    tc_ref    : (Bm2, 2*TH)     bf16  thoughts_prev ++ thoughts_next (time-invariant)
    dw_ref    : (T*Bm2, W)      bf16  delayed target word embeddings, time-major rows
    wih_th_ref: (2*TH, 4*HID)   bf16  W_ih[:, :2TH]^T
    wih_w_ref : (W, 4*HID)      bf16  W_ih[:, 2TH:]^T
    whh_ref   : (HID, 4*HID)    bf16  W_hh^T                (gate order i, f, g, o)
    b_ref     : (1, 4*HID)      f32   b_ih + b_hh
    wout_ref  : (HID, VOCAB)    bf16  worder.weight^T
    bout_ref  : (1, VOCAB)      f32   worder.bias
    pred_ref  : (T*Bm2, VOCAB)  f32   output logits, time-major rows
    hall_ref  : (T*Bm2, HID)    bf16  VMEM scratch: all LSTM hidden outputs
    """
    Bm2 = tc_ref.shape[0]
    T = dw_ref.shape[0] // Bm2

    # ---- hoisted, time-independent gate pre-activations (batched MXU work) ---
    gate_th = (jnp.dot(tc_ref[...], wih_th_ref[...],
                       preferred_element_type=jnp.float32)
               + b_ref[...])                                      # (Bm2, 4H) f32
    gate_w = jnp.dot(dw_ref[...], wih_w_ref[...],
                     preferred_element_type=jnp.float32)          # (T*Bm2, 4H) f32

    whh = whh_ref[...]
    h = jnp.zeros((Bm2, HID), jnp.float32)
    c = jnp.zeros((Bm2, HID), jnp.float32)

    # ---- serial recurrence: only h @ W_hh is left on the critical path -------
    # T is a compile-time constant; the loop is fully unrolled so every slice
    # and store below has static indices and the scheduler sees all timesteps.
    for t in range(T):
        gates = (gate_th
                 + gate_w[t * Bm2:(t + 1) * Bm2, :]
                 + jnp.dot(h.astype(jnp.bfloat16), whh,
                           preferred_element_type=jnp.float32))   # (Bm2, 4H) f32
        # full-tile transcendentals (EUP), then per-gate lane slices (i,f,g,o)
        sig = jax.nn.sigmoid(gates)
        tnh = jnp.tanh(gates)
        i = sig[:, 0 * HID:1 * HID]
        f = sig[:, 1 * HID:2 * HID]
        g = tnh[:, 2 * HID:3 * HID]
        o = sig[:, 3 * HID:4 * HID]
        c = f * c + i * g
        h = o * jnp.tanh(c)
        hall_ref[t * Bm2:(t + 1) * Bm2, :] = h.astype(jnp.bfloat16)

    # ---- one batched worder projection, dense unmasked (T*Bm2, V) store ------
    pred_ref[...] = (jnp.dot(hall_ref[...], wout_ref[...],
                             preferred_element_type=jnp.float32)
                     + bout_ref[...]).astype(pred_ref.dtype)


@jax.jit
def skip_decoder_pallas(thoughts, word_embeddings, params):
    """SkipDecoder.forward (teacher-forcing branch).

    thoughts:        (B, THOUGHT_SIZE)
    word_embeddings: (MAXLEN, B, WORD_SIZE)   (seq-first, as produced by Encoder)
    returns:         (B-2, MAXLEN, VOCAB_SIZE)
    """
    B = thoughts.shape[0]
    Bm2 = B - 2
    T = MAXLEN

    # time-invariant thought slab: built once, never repeated over T.
    thoughts_cat = jnp.concatenate([thoughts[:-2], thoughts[2:]],
                                   axis=1).astype(jnp.bfloat16)        # (Bm2, 2TH)

    # delayed teacher-forcing word embeddings, time-major, flattened to rows.
    target = word_embeddings[:, 1:-1, :]                               # (T, Bm2, W)
    delayed = jnp.concatenate([jnp.zeros_like(target[:1]), target[:-1]],
                              axis=0)                                  # (T, Bm2, W)
    delayed = delayed.reshape(T * Bm2, WORD_SIZE).astype(jnp.bfloat16)

    wih_th, wih_w, whh, b_sum, wout, bout = params

    pred = pl.pallas_call(
        _skip_decoder_kernel,
        out_shape=jax.ShapeDtypeStruct((T * Bm2, VOCAB_SIZE), jnp.float32),
        grid_spec=pltpu.PrefetchScalarGridSpec(
            num_scalar_prefetch=0,
            grid=(1,),       # single invocation: whole recurrence unrolled in-kernel
            in_specs=[
                pl.BlockSpec((Bm2, TH2), lambda i: (0, 0)),
                pl.BlockSpec((T * Bm2, WORD_SIZE), lambda i: (0, 0)),
                pl.BlockSpec((TH2, 4 * HID), lambda i: (0, 0)),
                pl.BlockSpec((WORD_SIZE, 4 * HID), lambda i: (0, 0)),
                pl.BlockSpec((HID, 4 * HID), lambda i: (0, 0)),
                pl.BlockSpec((1, 4 * HID), lambda i: (0, 0)),
                pl.BlockSpec((HID, VOCAB_SIZE), lambda i: (0, 0)),
                pl.BlockSpec((1, VOCAB_SIZE), lambda i: (0, 0)),
            ],
            out_specs=pl.BlockSpec((T * Bm2, VOCAB_SIZE), lambda i: (0, 0)),
            scratch_shapes=[
                pltpu.VMEM((T * Bm2, HID), jnp.bfloat16),   # all LSTM outputs
            ],
        ),
        compiler_params=pltpu.CompilerParams(
            dimension_semantics=("arbitrary",)),
    )(thoughts_cat, delayed, wih_th, wih_w, whh, b_sum, wout, bout)

    # time-major rows -> (B-2, T, V); cheap XLA glue (16 KB at toy size).
    return jnp.transpose(pred.reshape(T, Bm2, VOCAB_SIZE), (1, 0, 2))


def make_torch_params(key):
    """Deterministic parameters in the PyTorch nn.Module layout."""
    k = jax.random.split(key, 6)
    scale = 0.1
    # nn.LSTM(2*thought + word, word): weight_ih (4H, IN), weight_hh (4H, H)
    w_ih = scale * jax.random.normal(k[0], (4 * HID, IN_SIZE), jnp.float32)
    w_hh = scale * jax.random.normal(k[1], (4 * HID, HID), jnp.float32)
    b_ih = scale * jax.random.normal(k[2], (4 * HID,), jnp.float32)
    b_hh = scale * jax.random.normal(k[3], (4 * HID,), jnp.float32)
    # nn.Linear(word, VOCAB): weight (V, H), bias (V,)
    w_out = scale * jax.random.normal(k[4], (VOCAB_SIZE, HID), jnp.float32)
    b_out = scale * jax.random.normal(k[5], (VOCAB_SIZE,), jnp.float32)
    return (w_ih, w_hh, b_ih, b_hh, w_out, b_out)


def prepare_params(torch_params):
    """Kernel layout: split + transposed W_ih, summed bias, bf16 matmul weights."""
    w_ih, w_hh, b_ih, b_hh, w_out, b_out = torch_params
    return (w_ih[:, :TH2].T.astype(jnp.bfloat16),     # (2TH, 4H)
            w_ih[:, TH2:].T.astype(jnp.bfloat16),     # (W, 4H)
            w_hh.T.astype(jnp.bfloat16),              # (H, 4H)
            (b_ih + b_hh)[None, :],                   # (1, 4H) f32
            w_out.T.astype(jnp.bfloat16),             # (H, V)
            b_out[None, :])                           # (1, V) f32


def skip_decoder_reference(thoughts, word_embeddings, torch_params):
    """Pure-JAX reference structured exactly like the PyTorch forward (full x,
    un-split W_ih), with the same bf16-operand / f32-accumulate precision as
    the kernel.  Independently validates the wrapper glue and the W_ih split."""
    w_ih, w_hh, b_ih, b_hh, w_out, b_out = torch_params
    B = thoughts.shape[0]
    Bm2 = B - 2
    T = MAXLEN

    thoughts_rep = jnp.broadcast_to(thoughts[None], (T, B, THOUGHT_SIZE))
    thoughts_input = jnp.concatenate(
        [thoughts_rep[:, :-2, :], thoughts_rep[:, 2:, :]], axis=2)
    target = word_embeddings[:, 1:-1, :]
    delayed = jnp.concatenate([0.0 * target[-1:], target[:-1]], axis=0)
    x = jnp.concatenate([thoughts_input, delayed], axis=2).astype(jnp.bfloat16)

    wih_t = w_ih.T.astype(jnp.bfloat16)
    whh_t = w_hh.T.astype(jnp.bfloat16)
    b = (b_ih + b_hh)[None, :]
    wout_t = w_out.T.astype(jnp.bfloat16)

    def step(carry, xt):
        h, c = carry
        gates = (jnp.dot(xt, wih_t, preferred_element_type=jnp.float32)
                 + jnp.dot(h.astype(jnp.bfloat16), whh_t,
                           preferred_element_type=jnp.float32)
                 + b)
        i = jax.nn.sigmoid(gates[:, 0 * HID:1 * HID])
        f = jax.nn.sigmoid(gates[:, 1 * HID:2 * HID])
        g = jnp.tanh(gates[:, 2 * HID:3 * HID])
        o = jax.nn.sigmoid(gates[:, 3 * HID:4 * HID])
        c = f * c + i * g
        h = o * jnp.tanh(c)
        return (h, c), h

    h0 = jnp.zeros((Bm2, HID), jnp.float32)
    c0 = jnp.zeros((Bm2, HID), jnp.float32)
    _, hs = lax.scan(step, (h0, c0), x)                           # (T, Bm2, HID)
    pred = (jnp.dot(hs.astype(jnp.bfloat16).reshape(T * Bm2, HID), wout_t,
                    preferred_element_type=jnp.float32)
            + b_out[None, :])                                     # (T*Bm2, V)
    return jnp.transpose(pred.reshape(T, Bm2, VOCAB_SIZE), (1, 0, 2))


if __name__ == "__main__":
    key = jax.random.PRNGKey(0)
    k_t, k_w, k_p = jax.random.split(key, 3)

    thoughts = jax.random.normal(k_t, (BATCH, THOUGHT_SIZE), jnp.float32)
    word_embeddings = jnp.tanh(
        jax.random.normal(k_w, (MAXLEN, BATCH, WORD_SIZE), jnp.float32))
    torch_params = make_torch_params(k_p)
    params = prepare_params(torch_params)

    pred = skip_decoder_pallas(thoughts, word_embeddings, params)
    pred = jax.block_until_ready(pred)
    assert pred.shape == (BATCH - 2, MAXLEN, VOCAB_SIZE)

    ref = skip_decoder_reference(thoughts, word_embeddings, torch_params)
    # bf16 matmul operands / f32 accumulation in both kernel and reference;
    # tolerance covers accumulation-order and bf16 rounding-boundary effects.
    np.testing.assert_allclose(np.asarray(pred), np.asarray(ref),
                               rtol=1e-2, atol=1e-2)
    print("KERNEL_OK")
</pallas_src>

<mosaic_0001>
module attributes {stable_mosaic.version = 11 : i64} {
  func.func @_skip_decoder_kernel(%arg0: i32, %arg1: memref<4x128xbf16, #tpu.memory_space<vmem>>, %arg2: memref<32x32xbf16, #tpu.memory_space<vmem>>, %arg3: memref<128x128xbf16, #tpu.memory_space<vmem>>, %arg4: memref<32x128xbf16, #tpu.memory_space<vmem>>, %arg5: memref<32x128xbf16, #tpu.memory_space<vmem>>, %arg6: memref<1x128xf32, #tpu.memory_space<vmem>>, %arg7: memref<32x128xbf16, #tpu.memory_space<vmem>>, %arg8: memref<1x128xf32, #tpu.memory_space<vmem>>, %arg9: memref<32x128xf32, #tpu.memory_space<vmem>>, %arg10: memref<32x32xbf16, #tpu.memory_space<vmem>>) attributes {dimension_semantics = [#tpu.dimension_semantics<arbitrary>], iteration_bounds = array<i64: 1>, scalar_prefetch = 0 : i64, scratch_operands = 1 : i64, tpu.core_type = #tpu.core_type<tc>, window_params = [{pipeline_mode = #tpu.pipeline_mode<synchronous>, transform_indices = @transform_0, window_bounds = array<i64: 4, 128>}, {pipeline_mode = #tpu.pipeline_mode<synchronous>, transform_indices = @transform_1, window_bounds = array<i64: 32, 32>}, {pipeline_mode = #tpu.pipeline_mode<synchronous>, transform_indices = @transform_2, window_bounds = array<i64: 128, 128>}, {pipeline_mode = #tpu.pipeline_mode<synchronous>, transform_indices = @transform_3, window_bounds = array<i64: 32, 128>}, {pipeline_mode = #tpu.pipeline_mode<synchronous>, transform_indices = @transform_4, window_bounds = array<i64: 32, 128>}, {pipeline_mode = #tpu.pipeline_mode<synchronous>, transform_indices = @transform_5, window_bounds = array<i64: 1, 128>}, {pipeline_mode = #tpu.pipeline_mode<synchronous>, transform_indices = @transform_6, window_bounds = array<i64: 32, 128>}, {pipeline_mode = #tpu.pipeline_mode<synchronous>, transform_indices = @transform_7, window_bounds = array<i64: 1, 128>}, {pipeline_mode = #tpu.pipeline_mode<synchronous>, transform_indices = @transform_8, window_bounds = array<i64: 32, 128>}]} {
    %c0 = arith.constant 0 : index
    %c0_0 = arith.constant 0 : index
    %0 = vector.load %arg1[%c0, %c0_0] : memref<4x128xbf16, #tpu.memory_space<vmem>>, vector<4x128xbf16>
    %c0_1 = arith.constant 0 : index
    %c0_2 = arith.constant 0 : index
    %1 = vector.load %arg3[%c0_1, %c0_2] : memref<128x128xbf16, #tpu.memory_space<vmem>>, vector<128x128xbf16>
    %cst = arith.constant dense<0.000000e+00> : vector<4x128xf32>
    %2 = tpu.matmul %0, %1, %cst {dimension_numbers = #tpu.dot_dimension_numbers<[1], [0], [0], [1], [0, 0, 1, 1], [], []>} : vector<4x128xbf16>, vector<128x128xbf16>, vector<4x128xf32> -> vector<4x128xf32>
    %c0_3 = arith.constant 0 : index
    %c0_4 = arith.constant 0 : index
    %3 = vector.load %arg6[%c0_3, %c0_4] : memref<1x128xf32, #tpu.memory_space<vmem>>, vector<1x128xf32>
    %4 = vector.broadcast %3 : vector<1x128xf32> to vector<4x128xf32>
    %5 = arith.addf %2, %4 : vector<4x128xf32>
    %c0_5 = arith.constant 0 : index
    %c0_6 = arith.constant 0 : index
    %6 = vector.load %arg2[%c0_5, %c0_6] : memref<32x32xbf16, #tpu.memory_space<vmem>>, vector<32x32xbf16>
    %c0_7 = arith.constant 0 : index
    %c0_8 = arith.constant 0 : index
    %7 = vector.load %arg4[%c0_7, %c0_8] : memref<32x128xbf16, #tpu.memory_space<vmem>>, vector<32x128xbf16>
    %cst_9 = arith.constant dense<0.000000e+00> : vector<32x128xf32>
    %8 = tpu.matmul %6, %7, %cst_9 {dimension_numbers = #tpu.dot_dimension_numbers<[1], [0], [0], [1], [0, 0, 1, 1], [], []>} : vector<32x32xbf16>, vector<32x128xbf16>, vector<32x128xf32> -> vector<32x128xf32>
    %c0_10 = arith.constant 0 : index
    %c0_11 = arith.constant 0 : index
    %9 = vector.load %arg5[%c0_10, %c0_11] : memref<32x128xbf16, #tpu.memory_space<vmem>>, vector<32x128xbf16>
    %cst_12 = arith.constant 0.000000e+00 : f32
    %10 = vector.broadcast %cst_12 : f32 to vector<4x32xf32>
    %cst_13 = arith.constant 0.000000e+00 : f32
    %11 = vector.broadcast %cst_13 : f32 to vector<4x32xf32>
    %12 = vector.extract_strided_slice %8 {offsets = [0, 0], sizes = [4, 128], strides = [1, 1]} : vector<32x128xf32> to vector<4x128xf32>
    %13 = arith.addf %5, %12 : vector<4x128xf32>
    %14 = arith.truncf %10 : vector<4x32xf32> to vector<4x32xbf16>
    %cst_14 = arith.constant dense<0.000000e+00> : vector<4x128xf32>
    %15 = tpu.matmul %14, %9, %cst_14 {dimension_numbers = #tpu.dot_dimension_numbers<[1], [0], [0], [1], [0, 0, 1, 1], [], []>} : vector<4x32xbf16>, vector<32x128xbf16>, vector<4x128xf32> -> vector<4x128xf32>
    %16 = arith.addf %13, %15 : vector<4x128xf32>
    %17 = arith.negf %16 : vector<4x128xf32>
    %18 = math.exp %17 : vector<4x128xf32>
    %cst_15 = arith.constant 1.000000e+00 : f32
    %19 = vector.broadcast %cst_15 : f32 to vector<4x128xf32>
    %20 = arith.addf %19, %18 : vector<4x128xf32>
    %21 = arith.divf %19, %20 : vector<4x128xf32>
    %22 = math.tanh %16 : vector<4x128xf32>
    %23 = vector.extract_strided_slice %21 {offsets = [0, 0], sizes = [4, 32], strides = [1, 1]} : vector<4x128xf32> to vector<4x32xf32>
    %24 = vector.extract_strided_slice %21 {offsets = [0, 32], sizes = [4, 32], strides = [1, 1]} : vector<4x128xf32> to vector<4x32xf32>
    %25 = vector.extract_strided_slice %22 {offsets = [0, 64], sizes = [4, 32], strides = [1, 1]} : vector<4x128xf32> to vector<4x32xf32>
    %26 = vector.extract_strided_slice %21 {offsets = [0, 96], sizes = [4, 32], strides = [1, 1]} : vector<4x128xf32> to vector<4x32xf32>
    %27 = arith.mulf %24, %11 : vector<4x32xf32>
    %28 = arith.mulf %23, %25 : vector<4x32xf32>
    %29 = arith.addf %27, %28 : vector<4x32xf32>
    %30 = math.tanh %29 : vector<4x32xf32>
    %31 = arith.mulf %26, %30 : vector<4x32xf32>
    %32 = arith.truncf %31 : vector<4x32xf32> to vector<4x32xbf16>
    %c0_16 = arith.constant 0 : index
    %c0_17 = arith.constant 0 : index
    %33 = vector.load %arg10[%c0_16, %c0_17] : memref<32x32xbf16, #tpu.memory_space<vmem>>, vector<4x32xbf16>
    tpu.vector_store %arg10[%c0_16, %c0_17], %32 {strides = array<i32>} : memref<32x32xbf16, #tpu.memory_space<vmem>>, vector<4x32xbf16>,
    %34 = vector.extract_strided_slice %8 {offsets = [4, 0], sizes = [4, 128], strides = [1, 1]} : vector<32x128xf32> to vector<4x128xf32>
    %35 = arith.addf %5, %34 : vector<4x128xf32>
    %36 = arith.truncf %31 : vector<4x32xf32> to vector<4x32xbf16>
    %cst_18 = arith.constant dense<0.000000e+00> : vector<4x128xf32>
    %37 = tpu.matmul %36, %9, %cst_18 {dimension_numbers = #tpu.dot_dimension_numbers<[1], [0], [0], [1], [0, 0, 1, 1], [], []>} : vector<4x32xbf16>, vector<32x128xbf16>, vector<4x128xf32> -> vector<4x128xf32>
    %38 = arith.addf %35, %37 : vector<4x128xf32>
    %39 = arith.negf %38 : vector<4x128xf32>
    %40 = math.exp %39 : vector<4x128xf32>
    %cst_19 = arith.constant 1.000000e+00 : f32
    %41 = vector.broadcast %cst_19 : f32 to vector<4x128xf32>
    %42 = arith.addf %41, %40 : vector<4x128xf32>
    %43 = arith.divf %41, %42 : vector<4x128xf32>
    %44 = math.tanh %38 : vector<4x128xf32>
    %45 = vector.extract_strided_slice %43 {offsets = [0, 0], sizes = [4, 32], strides = [1, 1]} : vector<4x128xf32> to vector<4x32xf32>
    %46 = vector.extract_strided_slice %43 {offsets = [0, 32], sizes = [4, 32], strides = [1, 1]} : vector<4x128xf32> to vector<4x32xf32>
    %47 = vector.extract_strided_slice %44 {offsets = [0, 64], sizes = [4, 32], strides = [1, 1]} : vector<4x128xf32> to vector<4x32xf32>
    %48 = vector.extract_strided_slice %43 {offsets = [0, 96], sizes = [4, 32], strides = [1, 1]} : vector<4x128xf32> to vector<4x32xf32>
    %49 = arith.mulf %46, %29 : vector<4x32xf32>
    %50 = arith.mulf %45, %47 : vector<4x32xf32>
    %51 = arith.addf %49, %50 : vector<4x32xf32>
    %52 = math.tanh %51 : vector<4x32xf32>
    %53 = arith.mulf %48, %52 : vector<4x32xf32>
    %54 = arith.truncf %53 : vector<4x32xf32> to vector<4x32xbf16>
    %c4 = arith.constant 4 : index
    %c0_20 = arith.constant 0 : index
    %55 = vector.load %arg10[%c4, %c0_20] : memref<32x32xbf16, #tpu.memory_space<vmem>>, vector<4x32xbf16>
    tpu.vector_store %arg10[%c4, %c0_20], %54 {strides = array<i32>} : memref<32x32xbf16, #tpu.memory_space<vmem>>, vector<4x32xbf16>,
    %56 = vector.extract_strided_slice %8 {offsets = [8, 0], sizes = [4, 128], strides = [1, 1]} : vector<32x128xf32> to vector<4x128xf32>
    %57 = arith.addf %5, %56 : vector<4x128xf32>
    %58 = arith.truncf %53 : vector<4x32xf32> to vector<4x32xbf16>
    %cst_21 = arith.constant dense<0.000000e+00> : vector<4x128xf32>
    %59 = tpu.matmul %58, %9, %cst_21 {dimension_numbers = #tpu.dot_dimension_numbers<[1], [0], [0], [1], [0, 0, 1, 1], [], []>} : vector<4x32xbf16>, vector<32x128xbf16>, vector<4x128xf32> -> vector<4x128xf32>
    %60 = arith.addf %57, %59 : vector<4x128xf32>
    %61 = arith.negf %60 : vector<4x128xf32>
    %62 = math.exp %61 : vector<4x128xf32>
    %cst_22 = arith.constant 1.000000e+00 : f32
    %63 = vector.broadcast %cst_22 : f32 to vector<4x128xf32>
    %64 = arith.addf %63, %62 : vector<4x128xf32>
    %65 = arith.divf %63, %64 : vector<4x128xf32>
    %66 = math.tanh %60 : vector<4x128xf32>
    %67 = vector.extract_strided_slice %65 {offsets = [0, 0], sizes = [4, 32], strides = [1, 1]} : vector<4x128xf32> to vector<4x32xf32>
    %68 = vector.extract_strided_slice %65 {offsets = [0, 32], sizes = [4, 32], strides = [1, 1]} : vector<4x128xf32> to vector<4x32xf32>
    %69 = vector.extract_strided_slice %66 {offsets = [0, 64], sizes = [4, 32], strides = [1, 1]} : vector<4x128xf32> to vector<4x32xf32>
    %70 = vector.extract_strided_slice %65 {offsets = [0, 96], sizes = [4, 32], strides = [1, 1]} : vector<4x128xf32> to vector<4x32xf32>
    %71 = arith.mulf %68, %51 : vector<4x32xf32>
    %72 = arith.mulf %67, %69 : vector<4x32xf32>
    %73 = arith.addf %71, %72 : vector<4x32xf32>
    %74 = math.tanh %73 : vector<4x32xf32>
    %75 = arith.mulf %70, %74 : vector<4x32xf32>
    %76 = arith.truncf %75 : vector<4x32xf32> to vector<4x32xbf16>
    %c8 = arith.constant 8 : index
    %c0_23 = arith.constant 0 : index
    %77 = vector.load %arg10[%c8, %c0_23] : memref<32x32xbf16, #tpu.memory_space<vmem>>, vector<4x32xbf16>
    tpu.vector_store %arg10[%c8, %c0_23], %76 {strides = array<i32>} : memref<32x32xbf16, #tpu.memory_space<vmem>>, vector<4x32xbf16>,
    %78 = vector.extract_strided_slice %8 {offsets = [12, 0], sizes = [4, 128], strides = [1, 1]} : vector<32x128xf32> to vector<4x128xf32>
    %79 = arith.addf %5, %78 : vector<4x128xf32>
    %80 = arith.truncf %75 : vector<4x32xf32> to vector<4x32xbf16>
    %cst_24 = arith.constant dense<0.000000e+00> : vector<4x128xf32>
    %81 = tpu.matmul %80, %9, %cst_24 {dimension_numbers = #tpu.dot_dimension_numbers<[1], [0], [0], [1], [0, 0, 1, 1], [], []>} : vector<4x32xbf16>, vector<32x128xbf16>, vector<4x128xf32> -> vector<4x128xf32>
    %82 = arith.addf %79, %81 : vector<4x128xf32>
    %83 = arith.negf %82 : vector<4x128xf32>
    %84 = math.exp %83 : vector<4x128xf32>
    %cst_25 = arith.constant 1.000000e+00 : f32
    %85 = vector.broadcast %cst_25 : f32 to vector<4x128xf32>
    %86 = arith.addf %85, %84 : vector<4x128xf32>
    %87 = arith.divf %85, %86 : vector<4x128xf32>
    %88 = math.tanh %82 : vector<4x128xf32>
    %89 = vector.extract_strided_slice %87 {offsets = [0, 0], sizes = [4, 32], strides = [1, 1]} : vector<4x128xf32> to vector<4x32xf32>
    %90 = vector.extract_strided_slice %87 {offsets = [0, 32], sizes = [4, 32], strides = [1, 1]} : vector<4x128xf32> to vector<4x32xf32>
    %91 = vector.extract_strided_slice %88 {offsets = [0, 64], sizes = [4, 32], strides = [1, 1]} : vector<4x128xf32> to vector<4x32xf32>
    %92 = vector.extract_strided_slice %87 {offsets = [0, 96], sizes = [4, 32], strides = [1, 1]} : vector<4x128xf32> to vector<4x32xf32>
    %93 = arith.mulf %90, %73 : vector<4x32xf32>
    %94 = arith.mulf %89, %91 : vector<4x32xf32>
    %95 = arith.addf %93, %94 : vector<4x32xf32>
    %96 = math.tanh %95 : vector<4x32xf32>
    %97 = arith.mulf %92, %96 : vector<4x32xf32>
    %98 = arith.truncf %97 : vector<4x32xf32> to vector<4x32xbf16>
    %c12 = arith.constant 12 : index
    %c0_26 = arith.constant 0 : index
    %99 = vector.load %arg10[%c12, %c0_26] : memref<32x32xbf16, #tpu.memory_space<vmem>>, vector<4x32xbf16>
    tpu.vector_store %arg10[%c12, %c0_26], %98 {strides = array<i32>} : memref<32x32xbf16, #tpu.memory_space<vmem>>, vector<4x32xbf16>,
    %100 = vector.extract_strided_slice %8 {offsets = [16, 0], sizes = [4, 128], strides = [1, 1]} : vector<32x128xf32> to vector<4x128xf32>
    %101 = arith.addf %5, %100 : vector<4x128xf32>
    %102 = arith.truncf %97 : vector<4x32xf32> to vector<4x32xbf16>
    %cst_27 = arith.constant dense<0.000000e+00> : vector<4x128xf32>
    %103 = tpu.matmul %102, %9, %cst_27 {dimension_numbers = #tpu.dot_dimension_numbers<[1], [0], [0], [1], [0, 0, 1, 1], [], []>} : vector<4x32xbf16>, vector<32x128xbf16>, vector<4x128xf32> -> vector<4x128xf32>
    %104 = arith.addf %101, %103 : vector<4x128xf32>
    %105 = arith.negf %104 : vector<4x128xf32>
    %106 = math.exp %105 : vector<4x128xf32>
    %cst_28 = arith.constant 1.000000e+00 : f32
    %107 = vector.broadcast %cst_28 : f32 to vector<4x128xf32>
    %108 = arith.addf %107, %106 : vector<4x128xf32>
    %109 = arith.divf %107, %108 : vector<4x128xf32>
    %110 = math.tanh %104 : vector<4x128xf32>
    %111 = vector.extract_strided_slice %109 {offsets = [0, 0], sizes = [4, 32], strides = [1, 1]} : vector<4x128xf32> to vector<4x32xf32>
    %112 = vector.extract_strided_slice %109 {offsets = [0, 32], sizes = [4, 32], strides = [1, 1]} : vector<4x128xf32> to vector<4x32xf32>
    %113 = vector.extract_strided_slice %110 {offsets = [0, 64], sizes = [4, 32], strides = [1, 1]} : vector<4x128xf32> to vector<4x32xf32>
    %114 = vector.extract_strided_slice %109 {offsets = [0, 96], sizes = [4, 32], strides = [1, 1]} : vector<4x128xf32> to vector<4x32xf32>
    %115 = arith.mulf %112, %95 : vector<4x32xf32>
    %116 = arith.mulf %111, %113 : vector<4x32xf32>
    %117 = arith.addf %115, %116 : vector<4x32xf32>
    %118 = math.tanh %117 : vector<4x32xf32>
    %119 = arith.mulf %114, %118 : vector<4x32xf32>
    %120 = arith.truncf %119 : vector<4x32xf32> to vector<4x32xbf16>
    %c16 = arith.constant 16 : index
    %c0_29 = arith.constant 0 : index
    %121 = vector.load %arg10[%c16, %c0_29] : memref<32x32xbf16, #tpu.memory_space<vmem>>, vector<4x32xbf16>
    tpu.vector_store %arg10[%c16, %c0_29], %120 {strides = array<i32>} : memref<32x32xbf16, #tpu.memory_space<vmem>>, vector<4x32xbf16>,
    %122 = vector.extract_strided_slice %8 {offsets = [20, 0], sizes = [4, 128], strides = [1, 1]} : vector<32x128xf32> to vector<4x128xf32>
    %123 = arith.addf %5, %122 : vector<4x128xf32>
    %124 = arith.truncf %119 : vector<4x32xf32> to vector<4x32xbf16>
    %cst_30 = arith.constant dense<0.000000e+00> : vector<4x128xf32>
    %125 = tpu.matmul %124, %9, %cst_30 {dimension_numbers = #tpu.dot_dimension_numbers<[1], [0], [0], [1], [0, 0, 1, 1], [], []>} : vector<4x32xbf16>, vector<32x128xbf16>, vector<4x128xf32> -> vector<4x128xf32>
    %126 = arith.addf %123, %125 : vector<4x128xf32>
    %127 = arith.negf %126 : vector<4x128xf32>
    %128 = math.exp %127 : vector<4x128xf32>
    %cst_31 = arith.constant 1.000000e+00 : f32
    %129 = vector.broadcast %cst_31 : f32 to vector<4x128xf32>
    %130 = arith.addf %129, %128 : vector<4x128xf32>
    %131 = arith.divf %129, %130 : vector<4x128xf32>
    %132 = math.tanh %126 : vector<4x128xf32>
    %133 = vector.extract_strided_slice %131 {offsets = [0, 0], sizes = [4, 32], strides = [1, 1]} : vector<4x128xf32> to vector<4x32xf32>
    %134 = vector.extract_strided_slice %131 {offsets = [0, 32], sizes = [4, 32], strides = [1, 1]} : vector<4x128xf32> to vector<4x32xf32>
    %135 = vector.extract_strided_slice %132 {offsets = [0, 64], sizes = [4, 32], strides = [1, 1]} : vector<4x128xf32> to vector<4x32xf32>
    %136 = vector.extract_strided_slice %131 {offsets = [0, 96], sizes = [4, 32], strides = [1, 1]} : vector<4x128xf32> to vector<4x32xf32>
    %137 = arith.mulf %134, %117 : vector<4x32xf32>
    %138 = arith.mulf %133, %135 : vector<4x32xf32>
    %139 = arith.addf %137, %138 : vector<4x32xf32>
    %140 = math.tanh %139 : vector<4x32xf32>
    %141 = arith.mulf %136, %140 : vector<4x32xf32>
    %142 = arith.truncf %141 : vector<4x32xf32> to vector<4x32xbf16>
    %c20 = arith.constant 20 : index
    %c0_32 = arith.constant 0 : index
    %143 = vector.load %arg10[%c20, %c0_32] : memref<32x32xbf16, #tpu.memory_space<vmem>>, vector<4x32xbf16>
    tpu.vector_store %arg10[%c20, %c0_32], %142 {strides = array<i32>} : memref<32x32xbf16, #tpu.memory_space<vmem>>, vector<4x32xbf16>,
    %144 = vector.extract_strided_slice %8 {offsets = [24, 0], sizes = [4, 128], strides = [1, 1]} : vector<32x128xf32> to vector<4x128xf32>
    %145 = arith.addf %5, %144 : vector<4x128xf32>
    %146 = arith.truncf %141 : vector<4x32xf32> to vector<4x32xbf16>
    %cst_33 = arith.constant dense<0.000000e+00> : vector<4x128xf32>
    %147 = tpu.matmul %146, %9, %cst_33 {dimension_numbers = #tpu.dot_dimension_numbers<[1], [0], [0], [1], [0, 0, 1, 1], [], []>} : vector<4x32xbf16>, vector<32x128xbf16>, vector<4x128xf32> -> vector<4x128xf32>
    %148 = arith.addf %145, %147 : vector<4x128xf32>
    %149 = arith.negf %148 : vector<4x128xf32>
    %150 = math.exp %149 : vector<4x128xf32>
    %cst_34 = arith.constant 1.000000e+00 : f32
    %151 = vector.broadcast %cst_34 : f32 to vector<4x128xf32>
    %152 = arith.addf %151, %150 : vector<4x128xf32>
    %153 = arith.divf %151, %152 : vector<4x128xf32>
    %154 = math.tanh %148 : vector<4x128xf32>
    %155 = vector.extract_strided_slice %153 {offsets = [0, 0], sizes = [4, 32], strides = [1, 1]} : vector<4x128xf32> to vector<4x32xf32>
    %156 = vector.extract_strided_slice %153 {offsets = [0, 32], sizes = [4, 32], strides = [1, 1]} : vector<4x128xf32> to vector<4x32xf32>
    %157 = vector.extract_strided_slice %154 {offsets = [0, 64], sizes = [4, 32], strides = [1, 1]} : vector<4x128xf32> to vector<4x32xf32>
    %158 = vector.extract_strided_slice %153 {offsets = [0, 96], sizes = [4, 32], strides = [1, 1]} : vector<4x128xf32> to vector<4x32xf32>
    %159 = arith.mulf %156, %139 : vector<4x32xf32>
    %160 = arith.mulf %155, %157 : vector<4x32xf32>
    %161 = arith.addf %159, %160 : vector<4x32xf32>
    %162 = math.tanh %161 : vector<4x32xf32>
    %163 = arith.mulf %158, %162 : vector<4x32xf32>
    %164 = arith.truncf %163 : vector<4x32xf32> to vector<4x32xbf16>
    %c24 = arith.constant 24 : index
    %c0_35 = arith.constant 0 : index
    %165 = vector.load %arg10[%c24, %c0_35] : memref<32x32xbf16, #tpu.memory_space<vmem>>, vector<4x32xbf16>
    tpu.vector_store %arg10[%c24, %c0_35], %164 {strides = array<i32>} : memref<32x32xbf16, #tpu.memory_space<vmem>>, vector<4x32xbf16>,
    %166 = vector.extract_strided_slice %8 {offsets = [28, 0], sizes = [4, 128], strides = [1, 1]} : vector<32x128xf32> to vector<4x128xf32>
    %167 = arith.addf %5, %166 : vector<4x128xf32>
    %168 = arith.truncf %163 : vector<4x32xf32> to vector<4x32xbf16>
    %cst_36 = arith.constant dense<0.000000e+00> : vector<4x128xf32>
    %169 = tpu.matmul %168, %9, %cst_36 {dimension_numbers = #tpu.dot_dimension_numbers<[1], [0], [0], [1], [0, 0, 1, 1], [], []>} : vector<4x32xbf16>, vector<32x128xbf16>, vector<4x128xf32> -> vector<4x128xf32>
    %170 = arith.addf %167, %169 : vector<4x128xf32>
    %171 = arith.negf %170 : vector<4x128xf32>
    %172 = math.exp %171 : vector<4x128xf32>
    %cst_37 = arith.constant 1.000000e+00 : f32
    %173 = vector.broadcast %cst_37 : f32 to vector<4x128xf32>
    %174 = arith.addf %173, %172 : vector<4x128xf32>
    %175 = arith.divf %173, %174 : vector<4x128xf32>
    %176 = math.tanh %170 : vector<4x128xf32>
    %177 = vector.extract_strided_slice %175 {offsets = [0, 0], sizes = [4, 32], strides = [1, 1]} : vector<4x128xf32> to vector<4x32xf32>
    %178 = vector.extract_strided_slice %175 {offsets = [0, 32], sizes = [4, 32], strides = [1, 1]} : vector<4x128xf32> to vector<4x32xf32>
    %179 = vector.extract_strided_slice %176 {offsets = [0, 64], sizes = [4, 32], strides = [1, 1]} : vector<4x128xf32> to vector<4x32xf32>
    %180 = vector.extract_strided_slice %175 {offsets = [0, 96], sizes = [4, 32], strides = [1, 1]} : vector<4x128xf32> to vector<4x32xf32>
    %181 = arith.mulf %178, %161 : vector<4x32xf32>
    %182 = arith.mulf %177, %179 : vector<4x32xf32>
    %183 = arith.addf %181, %182 : vector<4x32xf32>
    %184 = math.tanh %183 : vector<4x32xf32>
    %185 = arith.mulf %180, %184 : vector<4x32xf32>
    %186 = arith.truncf %185 : vector<4x32xf32> to vector<4x32xbf16>
    %c28 = arith.constant 28 : index
    %c0_38 = arith.constant 0 : index
    %187 = vector.load %arg10[%c28, %c0_38] : memref<32x32xbf16, #tpu.memory_space<vmem>>, vector<4x32xbf16>
    tpu.vector_store %arg10[%c28, %c0_38], %186 {strides = array<i32>} : memref<32x32xbf16, #tpu.memory_space<vmem>>, vector<4x32xbf16>,
    %c0_39 = arith.constant 0 : index
    %c0_40 = arith.constant 0 : index
    %188 = vector.load %arg10[%c0_39, %c0_40] : memref<32x32xbf16, #tpu.memory_space<vmem>>, vector<32x32xbf16>
    %c0_41 = arith.constant 0 : index
    %c0_42 = arith.constant 0 : index
    %189 = vector.load %arg7[%c0_41, %c0_42] : memref<32x128xbf16, #tpu.memory_space<vmem>>, vector<32x128xbf16>
    %cst_43 = arith.constant dense<0.000000e+00> : vector<32x128xf32>
    %190 = tpu.matmul %188, %189, %cst_43 {dimension_numbers = #tpu.dot_dimension_numbers<[1], [0], [0], [1], [0, 0, 1, 1], [], []>} : vector<32x32xbf16>, vector<32x128xbf16>, vector<32x128xf32> -> vector<32x128xf32>
    %c0_44 = arith.constant 0 : index
    %c0_45 = arith.constant 0 : index
    %191 = vector.load %arg8[%c0_44, %c0_45] : memref<1x128xf32, #tpu.memory_space<vmem>>, vector<1x128xf32>
    %192 = vector.broadcast %191 : vector<1x128xf32> to vector<32x128xf32>
    %193 = arith.addf %190, %192 : vector<32x128xf32>
    %c0_46 = arith.constant 0 : index
    %c0_47 = arith.constant 0 : index
    %194 = vector.load %arg9[%c0_46, %c0_47] : memref<32x128xf32, #tpu.memory_space<vmem>>, vector<32x128xf32>
    tpu.vector_store %arg9[%c0_46, %c0_47], %193 {strides = array<i32>} : memref<32x128xf32, #tpu.memory_space<vmem>>, vector<32x128xf32>,
    return
  }
  func.func @transform_0(%arg0: i32) -> (i32, i32) {
    %c0_i32 = arith.constant 0 : i32
    %c0_i32_0 = arith.constant 0 : i32
    %c0_i32_1 = arith.constant 0 : i32
    return %c0_i32, %c0_i32_0 : i32, i32
  }
  func.func @transform_1(%arg0: i32) -> (i32, i32) {
    %c0_i32 = arith.constant 0 : i32
    %c0_i32_0 = arith.constant 0 : i32
    %c0_i32_1 = arith.constant 0 : i32
    return %c0_i32, %c0_i32_0 : i32, i32
  }
  func.func @transform_2(%arg0: i32) -> (i32, i32) {
    %c0_i32 = arith.constant 0 : i32
    %c0_i32_0 = arith.constant 0 : i32
    %c0_i32_1 = arith.constant 0 : i32
    return %c0_i32, %c0_i32_0 : i32, i32
  }
  func.func @transform_3(%arg0: i32) -> (i32, i32) {
    %c0_i32 = arith.constant 0 : i32
    %c0_i32_0 = arith.constant 0 : i32
    %c0_i32_1 = arith.constant 0 : i32
    return %c0_i32, %c0_i32_0 : i32, i32
  }
  func.func @transform_4(%arg0: i32) -> (i32, i32) {
    %c0_i32 = arith.constant 0 : i32
    %c0_i32_0 = arith.constant 0 : i32
    %c0_i32_1 = arith.constant 0 : i32
    return %c0_i32, %c0_i32_0 : i32, i32
  }
  func.func @transform_5(%arg0: i32) -> (i32, i32) {
    %c0_i32 = arith.constant 0 : i32
    %c0_i32_0 = arith.constant 0 : i32
    %c0_i32_1 = arith.constant 0 : i32
    return %c0_i32, %c0_i32_0 : i32, i32
  }
  func.func @transform_6(%arg0: i32) -> (i32, i32) {
    %c0_i32 = arith.constant 0 : i32
    %c0_i32_0 = arith.constant 0 : i32
    %c0_i32_1 = arith.constant 0 : i32
    return %c0_i32, %c0_i32_0 : i32, i32
  }
  func.func @transform_7(%arg0: i32) -> (i32, i32) {
    %c0_i32 = arith.constant 0 : i32
    %c0_i32_0 = arith.constant 0 : i32
    %c0_i32_1 = arith.constant 0 : i32
    return %c0_i32, %c0_i32_0 : i32, i32
  }
  func.func @transform_8(%arg0: i32) -> (i32, i32) {
    %c0_i32 = arith.constant 0 : i32
    %c0_i32_0 = arith.constant 0 : i32
    %c0_i32_1 = arith.constant 0 : i32
    return %c0_i32, %c0_i32_0 : i32, i32
  }
}

</mosaic_0001>

<bundles_post_ra>
// kernel: skip_decoder_pallas.1
= control target key start
LH: loop header
LB: loop body
LE: loop exit
PB: predicated region body
PF: predicated region fallthrough
CT: control target
= control target key end

     0   :  { %v1275_v0 = vmov 0.0   ;;  %vm1276_vm0 = vmmov 0   ;;  %vm172_vm1 = vcmask 261120   ;;  %v1277_v14 = vmov 0   ;;  %s1279_s10 = smov 32   ;;  %s1548_s2 = inlined_call_operand.vmem [shape: bf16[128,128], index: 2, kind: input, shape index: {}]   ;;  %s1549_s3 = inlined_call_operand.vmem [shape: bf16[32,128], index: 3, kind: input, shape index: {}]   ;;  %s1550_s1 = inlined_call_operand.vmem [shape: bf16[32,32], index: 1, kind: input, shape index: {}]   ;;  %s1551_s4 = inlined_call_operand.vmem [shape: bf16[32,128], index: 4, kind: input, shape index: {}]   ;;  %s1552_s0 = inlined_call_operand.vmem [shape: bf16[4,128], index: 0, kind: input, shape index: {}]   ;;  %s1553_s5 = inlined_call_operand.vmem [shape: f32[1,128], index: 5, kind: input, shape index: {}]   ;;  %s1554_s6 = inlined_call_operand.vmem [shape: bf16[32,128], index: 6, kind: input, shape index: {}]   ;;  %s1555_s7 = inlined_call_operand.vmem [shape: f32[1,128], index: 7, kind: input, shape index: {}]   ;;  %s1556_s8 = inlined_call_operand.vmem [shape: f32[32,128], index: 8, kind: output, shape index: {}]  }
   0x1   :  { %1088 = vmatprep.subr.bf16.mxu0 %v1275_v0  ;;  %v1193_v1 = vld [vmem:[%s1548_s2 + $0x38] sm:$0xff]   ;;  %1104 = vmatprep.mubr.msk.bf16.mxu0 %vm1276_vm0, %v1275_v0  ;;  %v1194_v2 = vld [vmem:[%s1548_s2 + $0x30] sm:$0xff]   ;;  %v1197_v3 = vld [vmem:[%s1549_s3 + $0x8] sm:$0xff]   ;;  %vm320_vm2 = vcmask 254976   ;;  %vm404_vm3 = vcmask 257026  }
   0x2   :  { %1089 = vmatpush3.bf16.msra.mxu0 %v1193_v1  ;;  %v1195_v4 = vld [vmem:[%s1548_s2 + $0x28] sm:$0xff]   ;;  %1108 = vmatprep.subr.bf16.mxu1 %v1197_v3  ;;  %v1199_v5 = vld [vmem:[%s1549_s3] sm:$0xff]   ;;  %v1198_v10 = vld [vmem:[%s1548_s2 + $0x18] sm:$0xff]  }
   0x3   :  { %1090 = vmatprep.subr.bf16.mxu0 %v1275_v0  ;;  %1109 = vmatpush3.bf16.msra.mxu1 %v1197_v3  ;;  %v1201_v6 = vld [vmem:[%s1550_s1] sm:$0xff]   ;;  %v1202_v8 = vld [vmem:[%s1550_s1 + $0x8] sm:$0xff]   ;;  %v1200_v12 = vld [vmem:[%s1548_s2 + $0x10] sm:$0xff]  }
   0x4   :  { %1110 = vmatprep.subr.bf16.mxu1 %v1199_v5  ;;  %v1196_v7 = vld [vmem:[%s1548_s2 + $0x20] sm:$0xff]   ;;  %1112 = vmatprep.mubr.msk.bf16.mxu1 %vm172_vm1, %v1201_v6  ;;  %v1359_v9 = vld [vmem:[%s1551_s4 + $0x8] sm:$0xff]  }
   0x5   :  { %v1371_v11 = vld [vmem:[%s1551_s4] sm:$0xff]   ;;  %v1204_v13 = vld [vmem:[%s1548_s2 + $0x8] sm:$0xff]  }
   0x6   :  { %1091 = vmatpush3.bf16.msra.mxu0 %v1194_v2  ;;  %v1206_v15 = vld [vmem:[%s1548_s2] sm:$0xff]  }
   0x7   :  { %1092 = vmatprep.subr.bf16.mxu0 %v1275_v0  ;;  %1111 = vmatpush3.bf16.msra.mxu1 %v1199_v5  ;;  %v30_v16 = vld [vmem:[%s1552_s0] sm:$0x3] }
   0x8   :  { %1116 = vmatprep.subr.bf16.mxu1 %v1275_v0  ;;  %v992_v25 = vld [vmem:[%s1553_s5] ss:$0 sm:$0xff]  ;;  %s1278_s5 = smov 64  }
   0xa   :  { %1093 = vmatpush3.bf16.msra.mxu0 %v1195_v4  ;;  %1113 = vmatmul.mubr.msk.bf16.vlgmr.msra.gmra.mxu1 %vm172_vm1, %v1202_v8 }
   0xb   :  { %1094 = vmatprep.subr.bf16.mxu0 %v1275_v0  ;;  %1117 = vmatpush3.bf16.msra.mxu1 %v1359_v9 }
   0xc   :  { %1118 = vmatprep.subr.bf16.mxu1 %v1275_v0  ;;  %1120 = vmatprep.mubr.msk.bf16.mxu1 %vm1276_vm0, %v1275_v0 }
   0xe   :  { %1095 = vmatpush3.bf16.msra.mxu0 %v1196_v7 }
   0xf   :  { %1096 = vmatprep.subr.bf16.mxu0 %v1275_v0  ;;  %1119 = vmatpush3.bf16.msra.mxu1 %v1371_v11 }
  0x10   :  { %1124 = vmatprep.subr.bf16.mxu1 %v1275_v0 }
  0x12   :  { %1097 = vmatpush3.bf16.msra.mxu0 %v1198_v10  ;;  %1121 = vmatmul.mubr.bf16.vlgmr.msra.gmra.mxu1 %v1277_v14 }
  0x13   :  { %1098 = vmatprep.subr.bf16.mxu0 %v1275_v0  ;;  %1125 = vmatpush3.bf16.msra.mxu1 %v1359_v9 }
  0x14   :  { %1126 = vmatprep.subr.bf16.mxu1 %v1275_v0  ;;  %1128 = vmatprep.mubr.msk.bf16.mxu1 %vm1276_vm0, %v1275_v0 }
  0x16   :  { %1099 = vmatpush3.bf16.msra.mxu0 %v1200_v12 }
  0x17   :  { %1100 = vmatprep.subr.bf16.mxu0 %v1275_v0  ;;  %1127 = vmatpush3.bf16.msra.mxu1 %v1371_v11 }
  0x18   :  { %1132 = vmatprep.subr.bf16.mxu1 %v1275_v0 }
  0x1a   :  { %1101 = vmatpush3.bf16.msra.mxu0 %v1204_v13 }
  0x1b   :  { %1102 = vmatprep.subr.bf16.mxu0 %v1275_v0 }
  0x1e   :  { %1103 = vmatpush3.bf16.msra.mxu0 %v1206_v15 }
  0x1f   :  { %1140 = vmatprep.subr.bf16.mxu0 %v1275_v0 }
  0x21   :  { %1105 = vmatmul.mubr.bf16.vlgmr.msra.gmra.mxu0 %v30_v16 }
  0x22   :  { %1141 = vmatpush3.bf16.msra.mxu0 %v1359_v9  ;;  %1144 = vmatprep.mubr.msk.bf16.mxu0 %vm1276_vm0, %v1275_v0 }
  0x23   :  { %1142 = vmatprep.subr.bf16.mxu0 %v1275_v0 }
  0x26   :  { %1143 = vmatpush3.bf16.msra.mxu0 %v1371_v11 }
  0x27   :  { %1156 = vmatprep.subr.bf16.mxu0 %v1275_v0 }
  0xca   :  { %v1114_v17 = vpop.f32.mrf.mxu1 }
  0xcb   :  { %v648_v30 = vrot.slane %v1114_v17, 4 }
  0xcc   :  { %v213_v18 = vpop.f32.mrf.mxu1 }
  0xcd   :  { %v323_v27 = vrot.slane %v213_v18, 4 }
  0xce   :  { %v1115_v19 = vpop.f32.mrf.mxu1 }
  0xcf   :  { %v810_v31 = vrot.slane %v1115_v19, 4 }
  0xd0   :  { %v216_v20 = vpop.f32.mrf.mxu1 }
  0xd1   :  { %v486_v28 = vrot.slane %v216_v20, 4 }
  0xd2   :  { %v282_v21 = vpop.f32.mrf.mxu1 }
  0xd4   :  { %v1122_v22 = vpop.f32.mrf.mxu1 }
  0xd6   :  { %v285_v23 = vpop.f32.mrf.mxu1 }
  0xd8   :  { %v1123_v24 = vpop.f32.mrf.mxu1 }
  0xe1   :  { %v136_v26 = vpop.f32.mrf.mxu0 }
  0xe2   :  { %v137_v29 = vadd.f32 %v992_v25, %v136_v26 }
  0xe3   :  { %v1106_v32 = vpop.f32.mrf.mxu0 }
  0xe4   :  { %v232_v33 = vadd.f32 %v213_v18, %v137_v29  ;;  %v325_v34 = vadd.f32 %v323_v27, %v137_v29  ;;  %v1409_v35 = vadd.f32 %v216_v20, %v137_v29  ;;  %v1411_v36 = vadd.f32 %v486_v28, %v137_v29 }
  0xe5   :  { %v139_v37 = vpop.f32.mrf.mxu0  ;;  %v1413_v38 = vadd.f32 %v1114_v17, %v137_v29  ;;  %v1415_v39 = vadd.f32 %v648_v30, %v137_v29  ;;  %v1417_v40 = vadd.f32 %v1115_v19, %v137_v29  ;;  %v1419_v41 = vadd.f32 %v810_v31, %v137_v29 }
  0xe6   :  { %v288_v42 = vadd.f32 %v282_v21, %v232_v33 }
  0xe7   :  { %v1107_v43 = vpop.f32.mrf.mxu0 }
  0xe8   :  { %1211 = vtanh.f32 %v288_v42  ;;  %v1009_v45 = vmul.f32 -1.442695, %v288_v42 }
  0xea   :  { %1213 = vpow2.f32 %v1009_v45 }
  0xf5   :  { %v1212_v44 = vpop.eup %1211 }
  0xf6   :  { %298 = vrot.lane.b32.xlu0 %v1212_v44, %s1278_s5 }
  0xf7   :  { %v1214_v46 = vpop.eup %1213 }
  0xf8   :  { %v292_v47 = vadd.f32 1.0, %v1214_v46 }
  0xfa   :  { %1215 = vrcp.f32 %v292_v47 }
 0x107   :  { %v1216_v48 = vpop.eup %1215 }
 0x108   :  { %v296_v51 = vmul.f32 0.0, %v1216_v48 }
 0x168   :  { %v299_v49 = vpop.permute.xlu0 %298 }
 0x169   :  { %v301_v50 = vmul.f32 %v1216_v48, %v299_v49 }
 0x16b   :  { %303 = vrot.lane.b32.xlu0 %v301_v50, %s1279_s10 }
 0x1dd   :  { %v304_v52 = vpop.permute.xlu0 %303 }
 0x1de   :  { %v306_v53 = vadd.f32 %v304_v52, %v296_v51 }
 0x1e0   :  { %1217 = vtanh.f32 %v306_v53 }
 0x1ed   :  { %v1218_v54 = vpop.eup %1217 }
 0x1ee   :  { %309 = vrot.lane.b32.xlu1 %v1218_v54, %s1278_s5 }
 0x260   :  { %v310_v55 = vpop.permute.xlu1 %309 }
 0x261   :  { %v312_v56 = vmul.f32 %v1216_v48, %v310_v55 }
 0x263   :  { %v1424_v57 = vpack.c.bf16 %v312_v56, %v312_v56 }
 0x265   :  { %326 = vrot.lane.b32.xlu1 %v1424_v57, %s1279_s10 }
 0x2d7   :  { %v327_v58 = vpop.permute.xlu1 %326 }
 0x2d8   :  { %1129 = vmatmul.mubr.msk.bf16.vlgmr.msra.gmra.mxu1 %vm172_vm1, %v327_v58 }
 0x2d9   :  { %1133 = vmatpush3.bf16.msra.mxu1 %v1359_v9  ;;  %1136 = vmatprep.mubr.msk.bf16.mxu1 %vm1276_vm0, %v1275_v0 }
 0x2da   :  { %1134 = vmatprep.subr.bf16.mxu1 %v1275_v0 }
 0x2dd   :  { %1135 = vmatpush3.bf16.msra.mxu1 %v1371_v11 }
 0x2de   :  { %1148 = vmatprep.subr.bf16.mxu1 %v1275_v0 }
 0x398   :  { %v365_v59 = vpop.f32.mrf.mxu1 }
 0x399   :  { %v371_v60 = vadd.f32 %v365_v59, %v325_v34 }
 0x39a   :  { %v1130_v61 = vpop.f32.mrf.mxu1 }
 0x39b   :  { %1219 = vtanh.f32 %v371_v60  ;;  %v1012_v2 = vmul.f32 -1.442695, %v371_v60 }
 0x39c   :  { %v368_v62 = vpop.f32.mrf.mxu1 }
 0x39d   :  { %1221 = vpow2.f32 %v1012_v2 }
 0x39e   :  { %v1131_v63 = vpop.f32.mrf.mxu1 }
 0x3a8   :  { %v1220_v1 = vpop.eup %1219 }
 0x3a9   :  { %381 = vrot.lane.b32.xlu0 %v1220_v1, %s1278_s5 }
 0x3aa   :  { %v1222_v3 = vpop.eup %1221 }
 0x3ab   :  { %v375_v4 = vadd.f32 1.0, %v1222_v3 }
 0x3ad   :  { %1223 = vrcp.f32 %v375_v4 }
 0x3ba   :  { %v1224_v5 = vpop.eup %1223 }
 0x3bb   :  { %v379_v8 = vmul.f32 %v1224_v5, %v306_v53 }
 0x41b   :  { %v382_v6 = vpop.permute.xlu0 %381 }
 0x41c   :  { %v384_v7 = vmul.f32 %v1224_v5, %v382_v6 }
 0x41e   :  { %386 = vrot.lane.b32.xlu1 %v384_v7, %s1279_s10 }
 0x490   :  { %v387_v10 = vpop.permute.xlu1 %386 }
 0x491   :  { %v389_v12 = vadd.f32 %v387_v10, %v379_v8 }
 0x493   :  { %1225 = vtanh.f32 %v389_v12 }
 0x4a0   :  { %v1226_v13 = vpop.eup %1225 }
 0x4a1   :  { %392 = vrot.lane.b32.xlu0 %v1226_v13, %s1278_s5 }
 0x513   :  { %v393_v14 = vpop.permute.xlu0 %392 }
 0x514   :  { %v395_v15 = vmul.f32 %v1224_v5, %v393_v14 }
 0x516   :  { %v1438_v16 = vpack.c.bf16 %v395_v15, %v395_v15 }
 0x518   :  { %407 = vrot.lane.b32.xlu1 %v1438_v16, %s1279_s10 }
 0x58a   :  { %v408_v17 = vpop.permute.xlu1 %407 }
 0x58b   :  { %1137 = vmatmul.mubr.msk.bf16.vlgmr.msra.gmra.mxu1 %vm172_vm1, %v408_v17 }
 0x58c   :  { %1149 = vmatpush3.bf16.msra.mxu1 %v1359_v9  ;;  %1152 = vmatprep.mubr.msk.bf16.mxu1 %vm1276_vm0, %v1275_v0 }
 0x58d   :  { %1150 = vmatprep.subr.bf16.mxu1 %v1275_v0 }
 0x590   :  { %1151 = vmatpush3.bf16.msra.mxu1 %v1371_v11 }
 0x591   :  { %1164 = vmatprep.subr.bf16.mxu1 %v1275_v0 }
 0x64b   :  { %v446_v18 = vpop.f32.mrf.mxu1 }
 0x64c   :  { %v452_v19 = vadd.f32 %v446_v18, %v1409_v35 }
 0x64d   :  { %v1138_v20 = vpop.f32.mrf.mxu1 }
 0x64e   :  { %1227 = vtanh.f32 %v452_v19  ;;  %v1015_v24 = vmul.f32 -1.442695, %v452_v19 }
 0x64f   :  { %v449_v21 = vpop.f32.mrf.mxu1 }
 0x650   :  { %1229 = vpow2.f32 %v1015_v24 }
 0x651   :  { %v1139_v22 = vpop.f32.mrf.mxu1 }
 0x65b   :  { %v1228_v23 = vpop.eup %1227 }
 0x65c   :  { %462 = vrot.lane.b32.xlu0 %v1228_v23, %s1278_s5 }
 0x65d   :  { %v1230_v25 = vpop.eup %1229 }
 0x65e   :  { %v456_v26 = vadd.f32 1.0, %v1230_v25 }
 0x660   :  { %1231 = vrcp.f32 %v456_v26 }
 0x66d   :  { %v1232_v27 = vpop.eup %1231 }
 0x66e   :  { %v460_v30 = vmul.f32 %v1232_v27, %v389_v12 }
 0x6ce   :  { %v463_v28 = vpop.permute.xlu0 %462 }
 0x6cf   :  { %v465_v29 = vmul.f32 %v1232_v27, %v463_v28 }
 0x6d1   :  { %467 = vrot.lane.b32.xlu1 %v465_v29, %s1279_s10 }
 0x743   :  { %v468_v31 = vpop.permute.xlu1 %467 }
 0x744   :  { %v470_v32 = vadd.f32 %v468_v31, %v460_v30 }
 0x746   :  { %1233 = vtanh.f32 %v470_v32 }
 0x753   :  { %v1234_v33 = vpop.eup %1233 }
 0x754   :  { %473 = vrot.lane.b32.xlu0 %v1234_v33, %s1278_s5 }
 0x7c6   :  { %v474_v34 = vpop.permute.xlu0 %473 }
 0x7c7   :  { %v476_v35 = vmul.f32 %v1232_v27, %v474_v34 }
 0x7c9   :  { %v1453_v37 = vpack.c.bf16 %v476_v35, %v476_v35 }
 0x7cb   :  { %489 = vrot.lane.b32.xlu1 %v1453_v37, %s1279_s10 }
 0x83d   :  { %v490_v42 = vpop.permute.xlu1 %489 }
 0x83e   :  { %1145 = vmatmul.mubr.msk.bf16.vlgmr.msra.gmra.mxu0 %vm172_vm1, %v490_v42 }
 0x83f   :  { %1157 = vmatpush3.bf16.msra.mxu0 %v1359_v9  ;;  %1160 = vmatprep.mubr.msk.bf16.mxu0 %vm1276_vm0, %v1275_v0 }
 0x840   :  { %1158 = vmatprep.subr.bf16.mxu0 %v1275_v0 }
 0x843   :  { %1159 = vmatpush3.bf16.msra.mxu0 %v1371_v11 }
 0x844   :  { %1172 = vmatprep.subr.bf16.mxu0 %v1275_v0 }
 0x8fe   :  { %v528_v43 = vpop.f32.mrf.mxu0 }
 0x8ff   :  { %v534_v44 = vadd.f32 %v528_v43, %v1411_v36 }
 0x900   :  { %v1146_v45 = vpop.f32.mrf.mxu0 }
 0x901   :  { %1235 = vtanh.f32 %v534_v44  ;;  %v1018_v49 = vmul.f32 -1.442695, %v534_v44 }
 0x902   :  { %v531_v46 = vpop.f32.mrf.mxu0 }
 0x903   :  { %1237 = vpow2.f32 %v1018_v49 }
 0x904   :  { %v1147_v47 = vpop.f32.mrf.mxu0 }
 0x90e   :  { %v1236_v48 = vpop.eup %1235 }
 0x90f   :  { %544 = vrot.lane.b32.xlu0 %v1236_v48, %s1278_s5 }
 0x910   :  { %v1238_v50 = vpop.eup %1237 }
 0x911   :  { %v538_v51 = vadd.f32 1.0, %v1238_v50 }
 0x913   :  { %1239 = vrcp.f32 %v538_v51 }
 0x920   :  { %v1240_v52 = vpop.eup %1239 }
 0x921   :  { %v542_v55 = vmul.f32 %v1240_v52, %v470_v32 }
 0x981   :  { %v545_v53 = vpop.permute.xlu0 %544 }
 0x982   :  { %v547_v54 = vmul.f32 %v1240_v52, %v545_v53 }
 0x984   :  { %549 = vrot.lane.b32.xlu1 %v547_v54, %s1279_s10 }
 0x9f6   :  { %v550_v56 = vpop.permute.xlu1 %549 }
 0x9f7   :  { %v552_v36 = vadd.f32 %v550_v56, %v542_v55 }
 0x9f9   :  { %1241 = vtanh.f32 %v552_v36 }
 0xa06   :  { %v1242_v58 = vpop.eup %1241 }
 0xa07   :  { %555 = vrot.lane.b32.xlu0 %v1242_v58, %s1278_s5 }
 0xa79   :  { %v556_v59 = vpop.permute.xlu0 %555 }
 0xa7a   :  { %v558_v60 = vmul.f32 %v1240_v52, %v556_v59 }
 0xa7c   :  { %v1468_v61 = vpack.c.bf16 %v558_v60, %v558_v60 }
 0xa7e   :  { %569 = vrot.lane.b32.xlu1 %v1468_v61, %s1279_s10 }
 0xaf0   :  { %v570_v62 = vpop.permute.xlu1 %569 }
 0xaf1   :  { %1153 = vmatmul.mubr.msk.bf16.vlgmr.msra.gmra.mxu1 %vm172_vm1, %v570_v62 }
 0xaf2   :  { %1165 = vmatpush3.bf16.msra.mxu1 %v1359_v9  ;;  %1168 = vmatprep.mubr.msk.bf16.mxu1 %vm1276_vm0, %v1275_v0 }
 0xaf3   :  { %1166 = vmatprep.subr.bf16.mxu1 %v1275_v0 }
 0xaf6   :  { %1167 = vmatpush3.bf16.msra.mxu1 %v1371_v11 }
 0xbb1   :  { %v608_v63 = vpop.f32.mrf.mxu1 }
 0xbb2   :  { %v614_v1 = vadd.f32 %v608_v63, %v1413_v38 }
 0xbb3   :  { %v1154_v2 = vpop.f32.mrf.mxu1 }
 0xbb4   :  { %1243 = vtanh.f32 %v614_v1  ;;  %v1021_v6 = vmul.f32 -1.442695, %v614_v1 }
 0xbb5   :  { %v611_v3 = vpop.f32.mrf.mxu1 }
 0xbb6   :  { %1245 = vpow2.f32 %v1021_v6 }
 0xbb7   :  { %v1155_v4 = vpop.f32.mrf.mxu1 }
 0xbc1   :  { %v1244_v5 = vpop.eup %1243 }
 0xbc2   :  { %624 = vrot.lane.b32.xlu0 %v1244_v5, %s1278_s5 }
 0xbc3   :  { %v1246_v7 = vpop.eup %1245 }
 0xbc4   :  { %v618_v8 = vadd.f32 1.0, %v1246_v7 }
 0xbc6   :  { %1247 = vrcp.f32 %v618_v8 }
 0xbd3   :  { %v1248_v10 = vpop.eup %1247 }
 0xbd4   :  { %v622_v14 = vmul.f32 %v1248_v10, %v552_v36 }
 0xc34   :  { %v625_v12 = vpop.permute.xlu0 %624 }
 0xc35   :  { %v627_v13 = vmul.f32 %v1248_v10, %v625_v12 }
 0xc37   :  { %629 = vrot.lane.b32.xlu1 %v627_v13, %s1279_s10 }
 0xca9   :  { %v630_v15 = vpop.permute.xlu1 %629 }
 0xcaa   :  { %v632_v38 = vadd.f32 %v630_v15, %v622_v14 }
 0xcac   :  { %1249 = vtanh.f32 %v632_v38 }
 0xcb9   :  { %v1250_v17 = vpop.eup %1249 }
 0xcba   :  { %635 = vrot.lane.b32.xlu0 %v1250_v17, %s1278_s5 }
 0xd2c   :  { %v636_v18 = vpop.permute.xlu0 %635 }
 0xd2d   :  { %v638_v19 = vmul.f32 %v1248_v10, %v636_v18 }
 0xd2f   :  { %v1482_v20 = vpack.c.bf16 %v638_v19, %v638_v19 }
 0xd31   :  { %651 = vrot.lane.b32.xlu1 %v1482_v20, %s1279_s10 }
 0xda3   :  { %v652_v21 = vpop.permute.xlu1 %651 }
 0xda4   :  { %1161 = vmatmul.mubr.msk.bf16.vlgmr.msra.gmra.mxu0 %vm172_vm1, %v652_v21 }
 0xda5   :  { %1173 = vmatpush3.bf16.msra.mxu0 %v1359_v9  ;;  %1176 = vmatprep.mubr.msk.bf16.mxu0 %vm1276_vm0, %v1275_v0 }
 0xda6   :  { %1174 = vmatprep.subr.bf16.mxu0 %v1275_v0 }
 0xda9   :  { %1175 = vmatpush3.bf16.msra.mxu0 %v1371_v11 }
 0xe64   :  { %v690_v22 = vpop.f32.mrf.mxu0 }
 0xe65   :  { %v696_v23 = vadd.f32 %v690_v22, %v1415_v39 }
 0xe66   :  { %v1162_v24 = vpop.f32.mrf.mxu0 }
 0xe67   :  { %1251 = vtanh.f32 %v696_v23  ;;  %v1024_v28 = vmul.f32 -1.442695, %v696_v23  ;;  %v1208_v23 = vld [vmem:[%s1554_s6 + $0x8] sm:$0xff]   ;;  %v1209_v24 = vld [vmem:[%s1554_s6] sm:$0xff]  }
 0xe68   :  { %v693_v25 = vpop.f32.mrf.mxu0  ;;  %1180 = vmatprep.subr.bf16.mxu1 %v1208_v23 }
 0xe69   :  { %1253 = vpow2.f32 %v1024_v28 }
 0xe6a   :  { %v1163_v26 = vpop.f32.mrf.mxu0 }
 0xe74   :  { %v1252_v27 = vpop.eup %1251 }
 0xe75   :  { %706 = vrot.lane.b32.xlu0 %v1252_v27, %s1278_s5 }
 0xe76   :  { %v1254_v9 = vpop.eup %1253 }
 0xe77   :  { %v700_v29 = vadd.f32 1.0, %v1254_v9 }
 0xe79   :  { %1255 = vrcp.f32 %v700_v29 }
 0xe86   :  { %v1256_v30 = vpop.eup %1255 }
 0xe87   :  { %v704_v11 = vmul.f32 %v1256_v30, %v632_v38 }
 0xee7   :  { %v707_v31 = vpop.permute.xlu0 %706 }
 0xee8   :  { %v709_v0 = vmul.f32 %v1256_v30, %v707_v31 }
 0xeea   :  { %711 = vrot.lane.b32.xlu1 %v709_v0, %s1279_s10  ;;  %v1032_v0 = vld [vmem:[%s1555_s7] ss:$0 sm:$0xff] }
 0xf5c   :  { %v712_v32 = vpop.permute.xlu1 %711 }
 0xf5d   :  { %v714_v39 = vadd.f32 %v712_v32, %v704_v11 }
 0xf5f   :  { %1257 = vtanh.f32 %v714_v39 }
 0xf6c   :  { %v1258_v33 = vpop.eup %1257 }
 0xf6d   :  { %717 = vrot.lane.b32.xlu0 %v1258_v33, %s1278_s5 }
 0xfdf   :  { %v718_v34 = vpop.permute.xlu0 %717 }
 0xfe0   :  { %v720_v35 = vmul.f32 %v1256_v30, %v718_v34 }
 0xfe2   :  { %v1496_v42 = vpack.c.bf16 %v720_v35, %v720_v35 }
 0xfe4   :  { %731 = vrot.lane.b32.xlu1 %v1496_v42, %s1279_s10  ;;  %v725_v22 = vrot.slane %v1496_v42, 6 }
0x1056   :  { %v732_v43 = vpop.permute.xlu1 %731 }
0x1057   :  { %1169 = vmatmul.mubr.msk.bf16.vlgmr.msra.gmra.mxu1 %vm172_vm1, %v732_v43 }
0x1058   :  { %1181 = vmatpush3.bf16.msra.mxu1 %v1208_v23 }
0x1059   :  { %1182 = vmatprep.subr.bf16.mxu1 %v1209_v24 }
0x105c   :  { %1183 = vmatpush3.bf16.msra.mxu1 %v1209_v24 }
0x1117   :  { %v770_v44 = vpop.f32.mrf.mxu1 }
0x1118   :  { %v776_v45 = vadd.f32 %v770_v44, %v1417_v40 }
0x1119   :  { %v1170_v46 = vpop.f32.mrf.mxu1 }
0x111a   :  { %1259 = vtanh.f32 %v776_v45  ;;  %v1027_v50 = vmul.f32 -1.442695, %v776_v45 }
0x111b   :  { %v773_v47 = vpop.f32.mrf.mxu1 }
0x111c   :  { %1261 = vpow2.f32 %v1027_v50 }
0x111d   :  { %v1171_v48 = vpop.f32.mrf.mxu1 }
0x1127   :  { %v1260_v49 = vpop.eup %1259 }
0x1128   :  { %786 = vrot.lane.b32.xlu0 %v1260_v49, %s1278_s5 }
0x1129   :  { %v1262_v51 = vpop.eup %1261 }
0x112a   :  { %v780_v52 = vadd.f32 1.0, %v1262_v51 }
0x112c   :  { %1263 = vrcp.f32 %v780_v52 }
0x1139   :  { %v1264_v53 = vpop.eup %1263 }
0x113a   :  { %v784_v56 = vmul.f32 %v1264_v53, %v714_v39 }
0x119a   :  { %v787_v54 = vpop.permute.xlu0 %786 }
0x119b   :  { %v789_v55 = vmul.f32 %v1264_v53, %v787_v54 }
0x119d   :  { %791 = vrot.lane.b32.xlu1 %v789_v55, %s1279_s10 }
0x120f   :  { %v792_v36 = vpop.permute.xlu1 %791 }
0x1210   :  { %v794_v40 = vadd.f32 %v792_v36, %v784_v56 }
0x1212   :  { %1265 = vtanh.f32 %v794_v40 }
0x121f   :  { %v1266_v58 = vpop.eup %1265 }
0x1220   :  { %797 = vrot.lane.b32.xlu0 %v1266_v58, %s1278_s5 }
0x1292   :  { %v798_v59 = vpop.permute.xlu0 %797 }
0x1293   :  { %v800_v60 = vmul.f32 %v1264_v53, %v798_v59 }
0x1295   :  { %v801_v62 = vpack.c.bf16 %v800_v60, %v800_v60 }
0x1297   :  { %813 = vrot.lane.b32.xlu1 %v801_v62, %s1279_s10 }
0x1309   :  { %v814_v63 = vpop.permute.xlu1 %813 }
0x130a   :  { %1177 = vmatmul.mubr.msk.bf16.vlgmr.msra.gmra.mxu0 %vm172_vm1, %v814_v63 }
0x13ca   :  { %v852_v1 = vpop.f32.mrf.mxu0 }
0x13cb   :  { %v858_v2 = vadd.f32 %v852_v1, %v1419_v41 }
0x13cc   :  { %v1178_v3 = vpop.f32.mrf.mxu0 }
0x13cd   :  { %1267 = vtanh.f32 %v858_v2  ;;  %v1030_v7 = vmul.f32 -1.442695, %v858_v2 }
0x13ce   :  { %v855_v4 = vpop.f32.mrf.mxu0 }
0x13cf   :  { %1269 = vpow2.f32 %v1030_v7 }
0x13d0   :  { %v1179_v5 = vpop.f32.mrf.mxu0 }
0x13da   :  { %v1268_v6 = vpop.eup %1267 }
0x13db   :  { %868 = vrot.lane.b32.xlu0 %v1268_v6, %s1278_s5 }
0x13dc   :  { %v1270_v8 = vpop.eup %1269 }
0x13dd   :  { %v862_v10 = vadd.f32 1.0, %v1270_v8 }
0x13df   :  { %1271 = vrcp.f32 %v862_v10 }
0x13ec   :  { %v1272_v12 = vpop.eup %1271 }
0x13ed   :  { %v866_v41 = vmul.f32 %v1272_v12, %v794_v40 }
0x144d   :  { %v869_v13 = vpop.permute.xlu0 %868 }
0x144e   :  { %v871_v14 = vmul.f32 %v1272_v12, %v869_v13 }
0x1450   :  { %873 = vrot.lane.b32.xlu1 %v871_v14, %s1279_s10 }
0x1454   :  { %317 = vrot.lane.b32.xlu1 %v1424_v57, %s1279_s10 }
0x1458   :  { %481 = vrot.lane.b32.xlu1 %v1453_v37, %s1279_s10  ;;  %v400_v37 = vrot.slane %v1438_v16, 6 }
0x145c   :  { %643 = vrot.lane.b32.xlu1 %v1482_v20, %s1279_s10  ;;  %v563_v20 = vrot.slane %v1468_v61, 6 }
0x1460   :  { %805 = vrot.lane.b32.xlu1 %v801_v62, %s1279_s10 }
0x14c2   :  { %v874_v15 = vpop.permute.xlu1 %873 }
0x14c3   :  { %v876_v38 = vadd.f32 %v874_v15, %v866_v41 }
0x14c5   :  { %1273 = vtanh.f32 %v876_v38 }
0x14c6   :  { %v318_v17 = vpop.permute.xlu1 %317 }
0x14c7   :  { %321 = vst.msk [vmem:[#allocation2] sm:$0x3] %vm320_vm2, %v318_v17 }
0x14ca   :  { %v482_v18 = vpop.permute.xlu1 %481 }
0x14cb   :  { %484 = vst.msk [vmem:[#allocation2 + $0x4] sm:$0x3] %vm320_vm2, %v482_v18 }
0x14ce   :  { %v644_v19 = vpop.permute.xlu1 %643 }
0x14cf   :  { %646 = vst.msk [vmem:[#allocation2 + $0x8] sm:$0x3] %vm320_vm2, %v644_v19 }
0x14d2   :  { %v1274_v57 = vpop.eup %1273  ;;  %v806_v21 = vpop.permute.xlu1 %805 }
0x14d3   :  { %808 = vst.msk [vmem:[#allocation2 + $0xc] sm:$0x3] %vm320_vm2, %v806_v21  ;;  %879 = vrot.lane.b32.xlu0 %v1274_v57, %s1278_s5 }
0x14d7   :  { %401 = vrot.lane.b32.xlu0 %v400_v37, %s1279_s10 }
0x14db   :  { %564 = vrot.lane.b32.xlu0 %v563_v20, %s1279_s10 }
0x14df   :  { %726 = vrot.lane.b32.xlu0 %v725_v22, %s1279_s10 }
0x1545   :  { %v880_v16 = vpop.permute.xlu0 %879 }
0x1546   :  { %v882_v25 = vmul.f32 %v1272_v12, %v880_v16 }
0x1548   :  { %v1046_v61 = vpack.c.bf16 %v882_v25, %v882_v25 }
0x1549   :  { %v402_v26 = vpop.permute.xlu0 %401 }
0x154a   :  { %v887_v27 = vrot.slane %v1046_v61, 6  ;;  %405 = vst.msk [vmem:[#allocation2] sm:$0xc] %vm404_vm3, %v402_v26 }
0x154c   :  { %888 = vrot.lane.b32.xlu0 %v887_v27, %s1279_s10 }
0x154d   :  { %v565_v28 = vpop.permute.xlu0 %564 }
0x154e   :  { %567 = vst.msk [vmem:[#allocation2 + $0x4] sm:$0xc] %vm404_vm3, %v565_v28 }
0x1551   :  { %v727_v9 = vpop.permute.xlu0 %726 }
0x1552   :  { %729 = vst.msk [vmem:[#allocation2 + $0x8] sm:$0xc] %vm404_vm3, %v727_v9 }
0x1555   :  { %v1207_v29 = vld [vmem:[#allocation2] sm:$0xff]  }
0x1556   :  { %1184 = vmatprep.mubr.msk.bf16.mxu1 %vm172_vm1, %v1207_v29 }
0x15be   :  { %v889_v30 = vpop.permute.xlu0 %888 }
0x15bf   :  { %891 = vst.msk [vmem:[#allocation2 + $0xc] sm:$0xc] %vm404_vm3, %v889_v30 }
0x15c6   :  { %v1210_v31 = vld [vmem:[#allocation2 + $0x8] sm:$0xff]  }
0x15c7   :  { %1185 = vmatmul.mubr.msk.bf16.vlgmr.msra.gmra.mxu1 %vm172_vm1, %v1210_v31 }
0x1687   :  { %v1186_v11 = vpop.f32.mrf.mxu1 }
0x1688   :  { %v978_v32 = vadd.f32 %v1186_v11, %v1032_v0 }
0x1689   :  { %v969_v39 = vpop.f32.mrf.mxu1 }
0x168a   :  { %986 = vst [vmem:[%s1556_s8 + $0x10] sm:$0xff] %v978_v32  ;;  %v970_v33 = vadd.f32 %v1032_v0, %v969_v39 }
0x168b   :  { %v1187_v34 = vpop.f32.mrf.mxu1 }
0x168c   :  { %984 = vst [vmem:[%s1556_s8] sm:$0xff] %v970_v33  ;;  %v981_v35 = vadd.f32 %v1187_v34, %v1032_v0 }
0x168d   :  { %v972_v42 = vpop.f32.mrf.mxu1 }
0x168e   :  { %987 = vst [vmem:[%s1556_s8 + $0x18] sm:$0xff] %v981_v35  ;;  %v973_v43 = vadd.f32 %v1032_v0, %v972_v42 }
0x1690   :  { %985 = vst [vmem:[%s1556_s8 + $0x8] sm:$0xff] %v973_v43 }

</bundles_post_ra>
